<compile_context>
chip_gen: v5e
topology: v5e:2x2
jax: 0.10.0
libtpu: 0.0.40
codegen_flags: <defaults>
</compile_context>

<pallas_src>
import functools

import jax
import jax.numpy as jnp
from jax.experimental import pallas as pl
from jax.experimental.pallas import tpu as pltpu


def _round_up(x, m):
    return (x + m - 1) // m * m


def _choose_tiling(batch, max_tile_b):
    """Pick (tile_b, batch_pad, n_tiles) with minimal padding; >=2 tiles for
    batch >= 16 so both v7x TensorCores get work."""
    batch8 = _round_up(batch, 8)
    n_tiles = max(1, -(-batch8 // max_tile_b))
    if batch >= 16:
        n_tiles = max(n_tiles, 2)
    tile_b = _round_up(-(-batch8 // n_tiles), 8)
    batch_pad = tile_b * n_tiles
    return tile_b, batch_pad, n_tiles


def _mlp_kernel(x_ref, w0_ref, w_ref, b_ref, out_ref, *, num_layers):
    """Fused forward pass of the L-layer MLP on one batch tile.

    x_ref:   (TILE_B, in_dim)  f32 activations, unpadded feature width
    w0_ref:  (in_dim, P)       layer-0 weight (out dim zero-padded to P)
    w_ref:   (L-1, P, P)       packed, zero-padded weights (resident in VMEM)
    b_ref:   (L, 1, P)         packed, zero-padded biases (f32)
    out_ref: (TILE_B, P)       f32, lane-dense (P multiple of 128)
    """
    w_dtype = w0_ref.dtype

    # Layer 0: true-K matmul against the unpadded first-layer weight.
    x = x_ref[...]
    lhs = x if x.dtype == w_dtype else x.astype(w_dtype)
    h = jnp.dot(lhs, w0_ref[...], preferred_element_type=jnp.float32)
    h = jnp.maximum(h + b_ref[0], 0.0)           # bias + ReLU in f32 (VPU)

    # Layers 1 .. L-1: 128x128 MXU-shaped matmuls on the packed weights.
    for layer in range(1, num_layers):
        lhs = h if h.dtype == w_dtype else h.astype(w_dtype)
        y = jnp.dot(lhs, w_ref[layer - 1], preferred_element_type=jnp.float32)
        y = y + b_ref[layer]                     # (1, P) broadcast add, f32
        if layer < num_layers - 1:
            y = jnp.maximum(y, 0.0)              # ReLU (not on last layer)
        h = y

    out_ref[...] = h.astype(out_ref.dtype)


def pack_params(params, *, weight_dtype=jnp.float32):
    """One-time packing: zero-pad feature dims to a common 128-lane width.

    Returns (w0, w_rest, b_packed, num_classes); call once at init, reuse for
    every forward call.  Zero padding is exact (ReLU(0)=0, zero rows/cols add
    nothing) and padded lanes are sliced off in fnn_forward.
    """
    num_layers = len(params)
    in_dim = params[0][0].shape[0]
    num_classes = params[-1][0].shape[1]
    pad_feat = max(_round_up(w.shape[1], 128) for w, _ in params)

    w0 = jnp.zeros((in_dim, pad_feat), weight_dtype)
    w0 = w0.at[:, : params[0][0].shape[1]].set(params[0][0].astype(weight_dtype))

    w_rest = jnp.zeros((num_layers - 1, pad_feat, pad_feat), weight_dtype)
    for layer in range(1, num_layers):
        w = params[layer][0]
        w_rest = w_rest.at[layer - 1, : w.shape[0], : w.shape[1]].set(
            w.astype(weight_dtype))

    b_packed = jnp.zeros((num_layers, 1, pad_feat), jnp.float32)
    for layer, (_, b) in enumerate(params):
        b_packed = b_packed.at[layer, 0, : b.reshape(-1).shape[0]].set(
            b.reshape(-1).astype(jnp.float32))

    return w0, w_rest, b_packed, num_classes


@functools.partial(jax.jit, static_argnames=("num_classes", "max_tile_b"))
def _fnn_forward_jit(x, w0, w_rest, b_packed, *, num_classes, max_tile_b):
    batch, in_dim = x.shape
    num_layers = w_rest.shape[0] + 1
    pad_feat = w0.shape[1]

    tile_b, batch_pad, n_tiles = _choose_tiling(batch, max_tile_b)

    x = x.astype(jnp.float32)
    if batch_pad != batch:
        x = jnp.zeros((batch_pad, in_dim), jnp.float32).at[:batch].set(x)

    bytes_w = w0.size * w0.dtype.itemsize + w_rest.size * w_rest.dtype.itemsize
    cost = pl.CostEstimate(
        flops=2 * batch_pad * (in_dim * pad_feat
                               + (num_layers - 1) * pad_feat * pad_feat),
        transcendentals=0,
        bytes_accessed=(x.size * 4 + bytes_w + b_packed.size * 4
                        + batch_pad * pad_feat * 4),
    )

    out_p = pl.pallas_call(
        functools.partial(_mlp_kernel, num_layers=num_layers),
        out_shape=jax.ShapeDtypeStruct((batch_pad, pad_feat), jnp.float32),
        grid=(n_tiles,),
        in_specs=[
            pl.BlockSpec((tile_b, in_dim), lambda i: (i, 0)),           # x tile
            pl.BlockSpec((in_dim, pad_feat), lambda i: (0, 0)),         # layer-0 W
            pl.BlockSpec((num_layers - 1, pad_feat, pad_feat),
                         lambda i: (0, 0, 0)),                          # packed W (resident)
            pl.BlockSpec((num_layers, 1, pad_feat),
                         lambda i: (0, 0, 0)),                          # packed b (resident)
        ],
        out_specs=pl.BlockSpec((tile_b, pad_feat), lambda i: (i, 0)),
        compiler_params=pltpu.CompilerParams(
            dimension_semantics=("parallel",)),
        cost_estimate=cost,
    )(x, w0, w_rest, b_packed)

    # Slice the valid region; fuses into this jit (no separate HBM pass).
    return out_p[:batch, :num_classes]


def fnn_forward(x, packed, *, max_tile_b=1024):
    w0, w_rest, b_packed, num_classes = packed
    return _fnn_forward_jit(x, w0, w_rest, b_packed,
                            num_classes=num_classes, max_tile_b=max_tile_b)


def init_params(key, input_size, hidden_size, num_classes):
    """Deterministic init mirroring torch.nn.Linear defaults (uniform +-1/sqrt(fan_in))."""
    sizes = [(input_size, hidden_size)] + \
            [(hidden_size, hidden_size)] * 6 + \
            [(hidden_size, num_classes)]
    params = []
    for (fan_in, fan_out) in sizes:
        key, kw, kb = jax.random.split(key, 3)
        bound = 1.0 / jnp.sqrt(jnp.float32(fan_in))
        w = jax.random.uniform(kw, (fan_in, fan_out), jnp.float32, -bound, bound)
        b = jax.random.uniform(kb, (1, fan_out), jnp.float32, -bound, bound)
        params.append((w, b))
    return params


def reference_forward(x, params):
    h = x
    for i, (w, b) in enumerate(params):
        h = h @ w + b
        if i < len(params) - 1:
            h = jnp.maximum(h, 0.0)
    return h


if __name__ == "__main__":
    input_size, hidden_size, num_classes = 64, 32, 8

    key = jax.random.PRNGKey(0)
    key, kx1, kx2 = jax.random.split(key, 3)
    params = init_params(key, input_size, hidden_size, num_classes)

    # Pack once at init (hoisted out of the per-call path).
    packed_f32 = pack_params(params, weight_dtype=jnp.float32)

    # --- f32 path, batch=8 (single tile): must match the reference tightly.
    x_small = jax.random.normal(kx1, (8, input_size), jnp.float32)
    out = jax.block_until_ready(fnn_forward(x_small, packed_f32))
    ref = reference_forward(x_small, params)
    assert out.shape == (8, num_classes)
    assert jnp.allclose(out, ref, atol=1e-4, rtol=1e-4), "mismatch vs reference (batch=8)"

    # --- f32 path, batch=136: exercises >=2 grid steps (v7x 2-TC sharding)
    #     and non-divisible batch padding (136 -> 2 x 72 rows).
    x_mid = jax.random.normal(kx2, (136, input_size), jnp.float32)
    out_mid = jax.block_until_ready(fnn_forward(x_mid, packed_f32))
    ref_mid = reference_forward(x_mid, params)
    assert out_mid.shape == (136, num_classes)
    assert jnp.allclose(out_mid, ref_mid, atol=1e-4, rtol=1e-4), "mismatch vs reference (batch=136)"

    # --- bf16 weight storage (bandwidth option): f32 MXU accumulation and
    #     f32 elementwise, so it lowers on v5e too.  Tolerance-tested.
    packed_bf16 = pack_params(params, weight_dtype=jnp.bfloat16)
    out_bf16 = jax.block_until_ready(fnn_forward(x_small, packed_bf16))
    assert out_bf16.shape == (8, num_classes)
    assert bool(jnp.all(jnp.isfinite(out_bf16)))
    assert jnp.allclose(out_bf16, ref, atol=5e-2, rtol=5e-2), "bf16 path drifted too far"

    print("KERNEL_OK")
</pallas_src>

<mosaic_0001>
module attributes {stable_mosaic.version = 11 : i64} {
  func.func @_mlp_kernel(%arg0: i32, %arg1: memref<8x64xf32, #tpu.memory_space<vmem>>, %arg2: memref<64x128xf32, #tpu.memory_space<vmem>>, %arg3: memref<7x128x128xf32, #tpu.memory_space<vmem>>, %arg4: memref<8x1x128xf32, #tpu.memory_space<vmem>>, %arg5: memref<8x128xf32, #tpu.memory_space<vmem>>) attributes {dimension_semantics = [#tpu.dimension_semantics<parallel>], iteration_bounds = array<i64: 1>, scalar_prefetch = 0 : i64, scratch_operands = 0 : i64, tpu.core_type = #tpu.core_type<tc>, window_params = [{transform_indices = @transform_0, window_bounds = array<i64: 8, 64>}, {pipeline_mode = #tpu.pipeline_mode<synchronous>, transform_indices = @transform_1, window_bounds = array<i64: 64, 128>}, {pipeline_mode = #tpu.pipeline_mode<synchronous>, transform_indices = @transform_2, window_bounds = array<i64: 7, 128, 128>}, {pipeline_mode = #tpu.pipeline_mode<synchronous>, transform_indices = @transform_3, window_bounds = array<i64: 8, 1, 128>}, {transform_indices = @transform_4, window_bounds = array<i64: 8, 128>}]} {
    %c0 = arith.constant 0 : index
    %c0_0 = arith.constant 0 : index
    %0 = vector.load %arg1[%c0, %c0_0] : memref<8x64xf32, #tpu.memory_space<vmem>>, vector<8x64xf32>
    %c0_1 = arith.constant 0 : index
    %c0_2 = arith.constant 0 : index
    %1 = vector.load %arg2[%c0_1, %c0_2] : memref<64x128xf32, #tpu.memory_space<vmem>>, vector<64x128xf32>
    %cst = arith.constant dense<0.000000e+00> : vector<8x128xf32>
    %2 = tpu.matmul %0, %1, %cst {dimension_numbers = #tpu.dot_dimension_numbers<[1], [0], [0], [1], [0, 0, 1, 1], [], []>} : vector<8x64xf32>, vector<64x128xf32>, vector<8x128xf32> -> vector<8x128xf32>
    %c0_3 = arith.constant 0 : index
    %c0_4 = arith.constant 0 : index
    %c0_5 = arith.constant 0 : index
    %3 = vector.load %arg4[%c0_3, %c0_4, %c0_5] : memref<8x1x128xf32, #tpu.memory_space<vmem>>, vector<1x1x128xf32>
    %4 = vector.shape_cast %3 : vector<1x1x128xf32> to vector<1x128xf32>
    %5 = vector.broadcast %4 : vector<1x128xf32> to vector<8x128xf32>
    %6 = arith.addf %2, %5 : vector<8x128xf32>
    %cst_6 = arith.constant 0.000000e+00 : f32
    %7 = vector.broadcast %cst_6 : f32 to vector<8x128xf32>
    %8 = arith.maximumf %6, %7 : vector<8x128xf32>
    %c0_7 = arith.constant 0 : index
    %c0_8 = arith.constant 0 : index
    %c0_9 = arith.constant 0 : index
    %9 = vector.load %arg3[%c0_7, %c0_8, %c0_9] : memref<7x128x128xf32, #tpu.memory_space<vmem>>, vector<1x128x128xf32>
    %10 = vector.shape_cast %9 : vector<1x128x128xf32> to vector<128x128xf32>
    %cst_10 = arith.constant dense<0.000000e+00> : vector<8x128xf32>
    %11 = tpu.matmul %8, %10, %cst_10 {dimension_numbers = #tpu.dot_dimension_numbers<[1], [0], [0], [1], [0, 0, 1, 1], [], []>} : vector<8x128xf32>, vector<128x128xf32>, vector<8x128xf32> -> vector<8x128xf32>
    %c1 = arith.constant 1 : index
    %c0_11 = arith.constant 0 : index
    %c0_12 = arith.constant 0 : index
    %12 = vector.load %arg4[%c1, %c0_11, %c0_12] : memref<8x1x128xf32, #tpu.memory_space<vmem>>, vector<1x1x128xf32>
    %13 = vector.shape_cast %12 : vector<1x1x128xf32> to vector<1x128xf32>
    %14 = vector.broadcast %13 : vector<1x128xf32> to vector<8x128xf32>
    %15 = arith.addf %11, %14 : vector<8x128xf32>
    %cst_13 = arith.constant 0.000000e+00 : f32
    %16 = vector.broadcast %cst_13 : f32 to vector<8x128xf32>
    %17 = arith.maximumf %15, %16 : vector<8x128xf32>
    %c1_14 = arith.constant 1 : index
    %c0_15 = arith.constant 0 : index
    %c0_16 = arith.constant 0 : index
    %18 = vector.load %arg3[%c1_14, %c0_15, %c0_16] : memref<7x128x128xf32, #tpu.memory_space<vmem>>, vector<1x128x128xf32>
    %19 = vector.shape_cast %18 : vector<1x128x128xf32> to vector<128x128xf32>
    %cst_17 = arith.constant dense<0.000000e+00> : vector<8x128xf32>
    %20 = tpu.matmul %17, %19, %cst_17 {dimension_numbers = #tpu.dot_dimension_numbers<[1], [0], [0], [1], [0, 0, 1, 1], [], []>} : vector<8x128xf32>, vector<128x128xf32>, vector<8x128xf32> -> vector<8x128xf32>
    %c2 = arith.constant 2 : index
    %c0_18 = arith.constant 0 : index
    %c0_19 = arith.constant 0 : index
    %21 = vector.load %arg4[%c2, %c0_18, %c0_19] : memref<8x1x128xf32, #tpu.memory_space<vmem>>, vector<1x1x128xf32>
    %22 = vector.shape_cast %21 : vector<1x1x128xf32> to vector<1x128xf32>
    %23 = vector.broadcast %22 : vector<1x128xf32> to vector<8x128xf32>
    %24 = arith.addf %20, %23 : vector<8x128xf32>
    %cst_20 = arith.constant 0.000000e+00 : f32
    %25 = vector.broadcast %cst_20 : f32 to vector<8x128xf32>
    %26 = arith.maximumf %24, %25 : vector<8x128xf32>
    %c2_21 = arith.constant 2 : index
    %c0_22 = arith.constant 0 : index
    %c0_23 = arith.constant 0 : index
    %27 = vector.load %arg3[%c2_21, %c0_22, %c0_23] : memref<7x128x128xf32, #tpu.memory_space<vmem>>, vector<1x128x128xf32>
    %28 = vector.shape_cast %27 : vector<1x128x128xf32> to vector<128x128xf32>
    %cst_24 = arith.constant dense<0.000000e+00> : vector<8x128xf32>
    %29 = tpu.matmul %26, %28, %cst_24 {dimension_numbers = #tpu.dot_dimension_numbers<[1], [0], [0], [1], [0, 0, 1, 1], [], []>} : vector<8x128xf32>, vector<128x128xf32>, vector<8x128xf32> -> vector<8x128xf32>
    %c3 = arith.constant 3 : index
    %c0_25 = arith.constant 0 : index
    %c0_26 = arith.constant 0 : index
    %30 = vector.load %arg4[%c3, %c0_25, %c0_26] : memref<8x1x128xf32, #tpu.memory_space<vmem>>, vector<1x1x128xf32>
    %31 = vector.shape_cast %30 : vector<1x1x128xf32> to vector<1x128xf32>
    %32 = vector.broadcast %31 : vector<1x128xf32> to vector<8x128xf32>
    %33 = arith.addf %29, %32 : vector<8x128xf32>
    %cst_27 = arith.constant 0.000000e+00 : f32
    %34 = vector.broadcast %cst_27 : f32 to vector<8x128xf32>
    %35 = arith.maximumf %33, %34 : vector<8x128xf32>
    %c3_28 = arith.constant 3 : index
    %c0_29 = arith.constant 0 : index
    %c0_30 = arith.constant 0 : index
    %36 = vector.load %arg3[%c3_28, %c0_29, %c0_30] : memref<7x128x128xf32, #tpu.memory_space<vmem>>, vector<1x128x128xf32>
    %37 = vector.shape_cast %36 : vector<1x128x128xf32> to vector<128x128xf32>
    %cst_31 = arith.constant dense<0.000000e+00> : vector<8x128xf32>
    %38 = tpu.matmul %35, %37, %cst_31 {dimension_numbers = #tpu.dot_dimension_numbers<[1], [0], [0], [1], [0, 0, 1, 1], [], []>} : vector<8x128xf32>, vector<128x128xf32>, vector<8x128xf32> -> vector<8x128xf32>
    %c4 = arith.constant 4 : index
    %c0_32 = arith.constant 0 : index
    %c0_33 = arith.constant 0 : index
    %39 = vector.load %arg4[%c4, %c0_32, %c0_33] : memref<8x1x128xf32, #tpu.memory_space<vmem>>, vector<1x1x128xf32>
    %40 = vector.shape_cast %39 : vector<1x1x128xf32> to vector<1x128xf32>
    %41 = vector.broadcast %40 : vector<1x128xf32> to vector<8x128xf32>
    %42 = arith.addf %38, %41 : vector<8x128xf32>
    %cst_34 = arith.constant 0.000000e+00 : f32
    %43 = vector.broadcast %cst_34 : f32 to vector<8x128xf32>
    %44 = arith.maximumf %42, %43 : vector<8x128xf32>
    %c4_35 = arith.constant 4 : index
    %c0_36 = arith.constant 0 : index
    %c0_37 = arith.constant 0 : index
    %45 = vector.load %arg3[%c4_35, %c0_36, %c0_37] : memref<7x128x128xf32, #tpu.memory_space<vmem>>, vector<1x128x128xf32>
    %46 = vector.shape_cast %45 : vector<1x128x128xf32> to vector<128x128xf32>
    %cst_38 = arith.constant dense<0.000000e+00> : vector<8x128xf32>
    %47 = tpu.matmul %44, %46, %cst_38 {dimension_numbers = #tpu.dot_dimension_numbers<[1], [0], [0], [1], [0, 0, 1, 1], [], []>} : vector<8x128xf32>, vector<128x128xf32>, vector<8x128xf32> -> vector<8x128xf32>
    %c5 = arith.constant 5 : index
    %c0_39 = arith.constant 0 : index
    %c0_40 = arith.constant 0 : index
    %48 = vector.load %arg4[%c5, %c0_39, %c0_40] : memref<8x1x128xf32, #tpu.memory_space<vmem>>, vector<1x1x128xf32>
    %49 = vector.shape_cast %48 : vector<1x1x128xf32> to vector<1x128xf32>
    %50 = vector.broadcast %49 : vector<1x128xf32> to vector<8x128xf32>
    %51 = arith.addf %47, %50 : vector<8x128xf32>
    %cst_41 = arith.constant 0.000000e+00 : f32
    %52 = vector.broadcast %cst_41 : f32 to vector<8x128xf32>
    %53 = arith.maximumf %51, %52 : vector<8x128xf32>
    %c5_42 = arith.constant 5 : index
    %c0_43 = arith.constant 0 : index
    %c0_44 = arith.constant 0 : index
    %54 = vector.load %arg3[%c5_42, %c0_43, %c0_44] : memref<7x128x128xf32, #tpu.memory_space<vmem>>, vector<1x128x128xf32>
    %55 = vector.shape_cast %54 : vector<1x128x128xf32> to vector<128x128xf32>
    %cst_45 = arith.constant dense<0.000000e+00> : vector<8x128xf32>
    %56 = tpu.matmul %53, %55, %cst_45 {dimension_numbers = #tpu.dot_dimension_numbers<[1], [0], [0], [1], [0, 0, 1, 1], [], []>} : vector<8x128xf32>, vector<128x128xf32>, vector<8x128xf32> -> vector<8x128xf32>
    %c6 = arith.constant 6 : index
    %c0_46 = arith.constant 0 : index
    %c0_47 = arith.constant 0 : index
    %57 = vector.load %arg4[%c6, %c0_46, %c0_47] : memref<8x1x128xf32, #tpu.memory_space<vmem>>, vector<1x1x128xf32>
    %58 = vector.shape_cast %57 : vector<1x1x128xf32> to vector<1x128xf32>
    %59 = vector.broadcast %58 : vector<1x128xf32> to vector<8x128xf32>
    %60 = arith.addf %56, %59 : vector<8x128xf32>
    %cst_48 = arith.constant 0.000000e+00 : f32
    %61 = vector.broadcast %cst_48 : f32 to vector<8x128xf32>
    %62 = arith.maximumf %60, %61 : vector<8x128xf32>
    %c6_49 = arith.constant 6 : index
    %c0_50 = arith.constant 0 : index
    %c0_51 = arith.constant 0 : index
    %63 = vector.load %arg3[%c6_49, %c0_50, %c0_51] : memref<7x128x128xf32, #tpu.memory_space<vmem>>, vector<1x128x128xf32>
    %64 = vector.shape_cast %63 : vector<1x128x128xf32> to vector<128x128xf32>
    %cst_52 = arith.constant dense<0.000000e+00> : vector<8x128xf32>
    %65 = tpu.matmul %62, %64, %cst_52 {dimension_numbers = #tpu.dot_dimension_numbers<[1], [0], [0], [1], [0, 0, 1, 1], [], []>} : vector<8x128xf32>, vector<128x128xf32>, vector<8x128xf32> -> vector<8x128xf32>
    %c7 = arith.constant 7 : index
    %c0_53 = arith.constant 0 : index
    %c0_54 = arith.constant 0 : index
    %66 = vector.load %arg4[%c7, %c0_53, %c0_54] : memref<8x1x128xf32, #tpu.memory_space<vmem>>, vector<1x1x128xf32>
    %67 = vector.shape_cast %66 : vector<1x1x128xf32> to vector<1x128xf32>
    %68 = vector.broadcast %67 : vector<1x128xf32> to vector<8x128xf32>
    %69 = arith.addf %65, %68 : vector<8x128xf32>
    %c0_55 = arith.constant 0 : index
    %c0_56 = arith.constant 0 : index
    %70 = vector.load %arg5[%c0_55, %c0_56] : memref<8x128xf32, #tpu.memory_space<vmem>>, vector<8x128xf32>
    tpu.vector_store %arg5[%c0_55, %c0_56], %69 {strides = array<i32>} : memref<8x128xf32, #tpu.memory_space<vmem>>, vector<8x128xf32>,
    return
  }
  func.func @transform_0(%arg0: i32) -> (i32, i32) {
    %c0_i32 = arith.constant 0 : i32
    %c0_i32_0 = arith.constant 0 : i32
    return %arg0, %c0_i32 : i32, i32
  }
  func.func @transform_1(%arg0: i32) -> (i32, i32) {
    %c0_i32 = arith.constant 0 : i32
    %c0_i32_0 = arith.constant 0 : i32
    %c0_i32_1 = arith.constant 0 : i32
    return %c0_i32, %c0_i32_0 : i32, i32
  }
  func.func @transform_2(%arg0: i32) -> (i32, i32, i32) {
    %c0_i32 = arith.constant 0 : i32
    %c0_i32_0 = arith.constant 0 : i32
    %c0_i32_1 = arith.constant 0 : i32
    %c0_i32_2 = arith.constant 0 : i32
    return %c0_i32, %c0_i32_0, %c0_i32_1 : i32, i32, i32
  }
  func.func @transform_3(%arg0: i32) -> (i32, i32, i32) {
    %c0_i32 = arith.constant 0 : i32
    %c0_i32_0 = arith.constant 0 : i32
    %c0_i32_1 = arith.constant 0 : i32
    %c0_i32_2 = arith.constant 0 : i32
    return %c0_i32, %c0_i32_0, %c0_i32_1 : i32, i32, i32
  }
  func.func @transform_4(%arg0: i32) -> (i32, i32) {
    %c0_i32 = arith.constant 0 : i32
    %c0_i32_0 = arith.constant 0 : i32
    return %arg0, %c0_i32 : i32, i32
  }
}

</mosaic_0001>

<bundles_post_ra>
// kernel: _fnn_forward_jit.1
= control target key start
LH: loop header
LB: loop body
LE: loop exit
PB: predicated region body
PF: predicated region fallthrough
CT: control target
= control target key end

     0   :  { %9 = vsyncpa [#allocation3], 0  ;;  %s631_s0 = inlined_call_operand.hbm [shape: f32[8,64], index: 0, kind: input, shape index: {}]   ;;  %s632_s1 = inlined_call_operand.hbm [shape: f32[64,128], index: 1, kind: input, shape index: {}]   ;;  %s633_s2 = inlined_call_operand.hbm [shape: f32[7,128,128], index: 2, kind: input, shape index: {}]   ;;  %s634_s3 = inlined_call_operand.hbm [shape: f32[8,1,128], index: 3, kind: input, shape index: {}]   ;;  %s635_s4 = inlined_call_operand.hbm [shape: f32[8,128], index: 4, kind: output, shape index: {}]  }
   0x1   :  { %10 = vsyncpa [#allocation6], 0 }
   0x2   :  { %11 = vsyncpa [#allocation9], 0  ;;  %s28_s17 = sshll.u32 %s632_s1, 4  ;;  %s29_s17 = int_to_ptr.hbm [resolvable:$true] %s28_s17 }
   0x3   :  { %12 = vsyncpa [#allocation4], 0  ;;  %s582_s18 = smov [#allocation5]   ;;  %s18_s22 = sshll.u32 %s631_s0, 4  ;;  %s19_s22 = int_to_ptr.hbm [resolvable:$true] %s18_s22 }
   0x4   :  { %s30_s19 = sshll.u32 %s582_s18, 4  ;;  %s583_s23 = smov 128   ;;  %s31_s19 = int_to_ptr.vmem [resolvable:$true] %s30_s19 }
   0x5   :  { %s584_s24 = smov 8   ;;  %s585_s25 = smov [#allocation2]  }
   0x6   :  { %36 = dma.hbm_to_vmem [thread:$0]  %s29_s17, 1024, %s31_s19, [#allocation6], %s583_s23, %s583_s23, %s584_s24  }
   0x7   :  { %s20_s26 = sshll.u32 %s585_s25, 4  ;;  %s41_s29 = sshll.u32 %s633_s2, 4  ;;  %s21_s26 = int_to_ptr.vmem [resolvable:$true] %s20_s26  ;;  %s42_s29 = int_to_ptr.hbm [resolvable:$true] %s41_s29 }
   0x8   :  { %23 = dma.hbm_to_vmem [thread:$0]  %s19_s22, 128, %s21_s26, [#allocation3]  }
   0x9   :  { %s54_s5 = sshll.u32 %s634_s3, 4  ;;  %s586_s6 = smov [#allocation7]   ;;  %s55_s5 = int_to_ptr.hbm [resolvable:$true] %s54_s5 }
   0xa   :  { %s43_s7 = sshll.u32 %s586_s6, 4  ;;  %s587_s0 = smov [#allocation8]   ;;  %s44_s7 = int_to_ptr.vmem [resolvable:$true] %s43_s7 }
   0xb   :  { %49 = dma.hbm_to_vmem [thread:$0]  %s42_s29, 14336, %s44_s7, [#allocation6], %s583_s23, %s583_s23, %s584_s24  }
   0xc   :  { %s56_s8 = sshll.u32 %s587_s0, 4  ;;  %s588_s9 = smov 16   ;;  %s57_s8 = int_to_ptr.vmem [resolvable:$true] %s56_s8 }
   0xd   :  { %s589_s10 = smov 1  }
   0xe   :  { %62 = dma.hbm_to_vmem [thread:$0]  %s55_s5, 128, %s57_s8, [#allocation9], %s588_s9, %s588_s9, %s589_s10  }
   0xf   :  { %574 = dma.done.wait [#allocation3], 128  }
  0x10   :  { %575 = vsyncadd [#allocation3], 4294967168 }
  0x11   :  { %576 = dma.done.wait [#allocation6], 15360  }
  0x12   :  { %577 = vsyncadd [#allocation6], 4294951936 }
  0x13   :  { %578 = dma.done.wait [#allocation9], 128  }
  0x14   :  { %579 = vsyncadd [#allocation9], 4294967168  ;;  %v87_v0 = vld [vmem:[#allocation5 + $0x38] sm:$0xff]  ;;  %v86_v1 = vld [vmem:[#allocation5 + $0x30] sm:$0xff]  ;;  %vm92_vm0 = vcmask 523264   ;;  %s590_s2 = smov [#allocation10]  }
  0x15   :  { %104 = vmatpush.msra.mxu0 %v87_v0  ;;  %v85_v2 = vld [vmem:[#allocation5 + $0x28] sm:$0xff]  ;;  %v132_v3 = vld [vmem:[#allocation7 + $0x78] sm:$0xff]  ;;  %v131_v4 = vld [vmem:[#allocation7 + $0x70] sm:$0xff]  ;;  %s422_s3 = sshll.u32 %s590_s2, 4  ;;  %s424_s13 = sshll.u32 %s635_s4, 4  ;;  %s423_s3 = int_to_ptr.vmem [resolvable:$true] %s422_s3  ;;  %s425_s13 = int_to_ptr.hbm [resolvable:$true] %s424_s13 }
  0x16   :  { %v84_v5 = vld [vmem:[#allocation5 + $0x20] sm:$0xff]  ;;  %138 = vmatpush.msra.mxu1 %v132_v3  ;;  %v130_v6 = vld [vmem:[#allocation7 + $0x68] sm:$0xff]  ;;  %v83_v7 = vld [vmem:[#allocation5 + $0x18] sm:$0xff] }
  0x17   :  { %105 = vmatpush.msra.mxu0 %v86_v1  ;;  %v82_v8 = vld [vmem:[#allocation5 + $0x10] sm:$0xff]  ;;  %v129_v9 = vld [vmem:[#allocation7 + $0x60] sm:$0xff]  ;;  %v128_v10 = vld [vmem:[#allocation7 + $0x58] sm:$0xff] }
  0x18   :  { %139 = vmatpush.msra.mxu1 %v131_v4  ;;  %v81_v11 = vld [vmem:[#allocation5 + $0x8] sm:$0xff]  ;;  %v127_v12 = vld [vmem:[#allocation7 + $0x50] sm:$0xff]  ;;  %v80_v13 = vld [vmem:[#allocation5] sm:$0xff] }
  0x19   :  { %106 = vmatpush.msra.mxu0 %v85_v2  ;;  %v79_v14 = vld [vmem:[#allocation2] sm:$0xff]  ;;  %v126_v15 = vld [vmem:[#allocation7 + $0x48] sm:$0xff]  ;;  %v125_v16 = vld [vmem:[#allocation7 + $0x40] sm:$0xff] }
  0x1a   :  { %140 = vmatpush.msra.mxu1 %v130_v6  ;;  %v124_v17 = vld [vmem:[#allocation7 + $0x38] sm:$0xff]  ;;  %v123_v18 = vld [vmem:[#allocation7 + $0x30] sm:$0xff]  ;;  %v122_v19 = vld [vmem:[#allocation7 + $0x28] sm:$0xff] }
  0x1b   :  { %107 = vmatpush.msra.mxu0 %v84_v5  ;;  %v121_v20 = vld [vmem:[#allocation7 + $0x20] sm:$0xff]  ;;  %v120_v21 = vld [vmem:[#allocation7 + $0x18] sm:$0xff]  ;;  %v119_v22 = vld [vmem:[#allocation7 + $0x10] sm:$0xff] }
  0x1c   :  { %141 = vmatpush.msra.mxu1 %v129_v9  ;;  %v118_v23 = vld [vmem:[#allocation7 + $0x8] sm:$0xff]  ;;  %v117_v24 = vld [vmem:[#allocation7] sm:$0xff]  ;;  %v175_v25 = vld [vmem:[#allocation7 + $0xf8] sm:$0xff] }
  0x1d   :  { %108 = vmatpush.msra.mxu0 %v83_v7  ;;  %v174_v26 = vld [vmem:[#allocation7 + $0xf0] sm:$0xff]  ;;  %181 = vmatpush.msra.mxu2 %v175_v25  ;;  %v173_v27 = vld [vmem:[#allocation7 + $0xe8] sm:$0xff]  ;;  %v172_v28 = vld [vmem:[#allocation7 + $0xe0] sm:$0xff] }
  0x1e   :  { %142 = vmatpush.msra.mxu1 %v128_v10  ;;  %v171_v29 = vld [vmem:[#allocation7 + $0xd8] sm:$0xff]  ;;  %v170_v30 = vld [vmem:[#allocation7 + $0xd0] sm:$0xff]  ;;  %v169_v31 = vld [vmem:[#allocation7 + $0xc8] sm:$0xff] }
  0x1f   :  { %109 = vmatpush.msra.mxu0 %v82_v8  ;;  %182 = vmatpush.msra.mxu2 %v174_v26  ;;  %v168_v32 = vld [vmem:[#allocation7 + $0xc0] sm:$0xff]  ;;  %v167_v33 = vld [vmem:[#allocation7 + $0xb8] sm:$0xff]  ;;  %v166_v34 = vld [vmem:[#allocation7 + $0xb0] sm:$0xff] }
  0x20   :  { %143 = vmatpush.msra.mxu1 %v127_v12  ;;  %v165_v35 = vld [vmem:[#allocation7 + $0xa8] sm:$0xff]  ;;  %v164_v36 = vld [vmem:[#allocation7 + $0xa0] sm:$0xff]  ;;  %v163_v37 = vld [vmem:[#allocation7 + $0x98] sm:$0xff] }
  0x21   :  { %110 = vmatpush.msra.mxu0 %v81_v11  ;;  %183 = vmatpush.msra.mxu2 %v173_v27  ;;  %v446_v38 = vld [vmem:[#allocation8] ss:$0 sm:$0xff]  ;;  %v162_v42 = vld [vmem:[#allocation7 + $0x90] sm:$0xff]  ;;  %v161_v43 = vld [vmem:[#allocation7 + $0x88] sm:$0xff] }
  0x22   :  { %144 = vmatpush.msra.mxu1 %v126_v15  ;;  %v160_v44 = vld [vmem:[#allocation7 + $0x80] sm:$0xff]  ;;  %v218_v45 = vld [vmem:[#allocation7 + $0x178] sm:$0xff]  ;;  %v217_v46 = vld [vmem:[#allocation7 + $0x170] sm:$0xff] }
  0x23   :  { %111 = vmatpush.msra.mxu0 %v80_v13  ;;  %184 = vmatpush.msra.mxu2 %v172_v28  ;;  %v216_v47 = vld [vmem:[#allocation7 + $0x168] sm:$0xff]  ;;  %v215_v48 = vld [vmem:[#allocation7 + $0x160] sm:$0xff]  ;;  %v214_v49 = vld [vmem:[#allocation7 + $0x158] sm:$0xff] }
  0x24   :  { %436 = vmatmul.msk.f32.vlgmr.msra.gmra.mxu0 %vm92_vm0, %v79_v14  ;;  %145 = vmatpush.msra.mxu1 %v125_v16  ;;  %v213_v50 = vld [vmem:[#allocation7 + $0x150] sm:$0xff]  ;;  %v212_v51 = vld [vmem:[#allocation7 + $0x148] sm:$0xff]  ;;  %v211_v52 = vld [vmem:[#allocation7 + $0x140] sm:$0xff] }
  0x25   :  { %185 = vmatpush.msra.mxu2 %v171_v29  ;;  %224 = vmatpush.msra.mxu3 %v218_v45  ;;  %v210_v53 = vld [vmem:[#allocation7 + $0x138] sm:$0xff]  ;;  %v209_v54 = vld [vmem:[#allocation7 + $0x130] sm:$0xff]  ;;  %v208_v55 = vld [vmem:[#allocation7 + $0x128] sm:$0xff] }
  0x26   :  { %146 = vmatpush.msra.mxu1 %v124_v17  ;;  %v207_v56 = vld [vmem:[#allocation7 + $0x120] sm:$0xff]  ;;  %v206_v57 = vld [vmem:[#allocation7 + $0x118] sm:$0xff]  ;;  %v205_v62 = vld [vmem:[#allocation7 + $0x110] sm:$0xff] }
  0x27   :  { %186 = vmatpush.msra.mxu2 %v170_v30  ;;  %225 = vmatpush.msra.mxu3 %v217_v46  ;;  %v447_v58 = vld [vmem:[#allocation8 + $0x1] ss:$0 sm:$0xff]  ;;  %v204_v63 = vld [vmem:[#allocation7 + $0x108] sm:$0xff]  ;;  %v261_v1 = vld [vmem:[#allocation7 + $0x1f8] sm:$0xff] }
  0x28   :  { %147 = vmatpush.msra.mxu1 %v123_v18  ;;  %v203_v0 = vld [vmem:[#allocation7 + $0x100] sm:$0xff]  ;;  %v260_v2 = vld [vmem:[#allocation7 + $0x1f0] sm:$0xff]  ;;  %267 = vmatpush.msrb.mxu0 %v261_v1  ;;  %v259_v3 = vld [vmem:[#allocation7 + $0x1e8] sm:$0xff] }
  0x29   :  { %187 = vmatpush.msra.mxu2 %v169_v31  ;;  %226 = vmatpush.msra.mxu3 %v216_v47  ;;  %v258_v4 = vld [vmem:[#allocation7 + $0x1e0] sm:$0xff]  ;;  %v257_v5 = vld [vmem:[#allocation7 + $0x1d8] sm:$0xff]  ;;  %v256_v6 = vld [vmem:[#allocation7 + $0x1d0] sm:$0xff] }
  0x2a   :  { %148 = vmatpush.msra.mxu1 %v122_v19  ;;  %268 = vmatpush.msrb.mxu0 %v260_v2  ;;  %v255_v7 = vld [vmem:[#allocation7 + $0x1c8] sm:$0xff]  ;;  %v254_v8 = vld [vmem:[#allocation7 + $0x1c0] sm:$0xff]  ;;  %v253_v9 = vld [vmem:[#allocation7 + $0x1b8] sm:$0xff] }
  0x2b   :  { %188 = vmatpush.msra.mxu2 %v168_v32  ;;  %227 = vmatpush.msra.mxu3 %v215_v48  ;;  %v252_v10 = vld [vmem:[#allocation7 + $0x1b0] sm:$0xff]  ;;  %v251_v11 = vld [vmem:[#allocation7 + $0x1a8] sm:$0xff]  ;;  %v250_v12 = vld [vmem:[#allocation7 + $0x1a0] sm:$0xff] }
  0x2c   :  { %149 = vmatpush.msra.mxu1 %v121_v20  ;;  %269 = vmatpush.msrb.mxu0 %v259_v3  ;;  %v249_v13 = vld [vmem:[#allocation7 + $0x198] sm:$0xff]  ;;  %v448_v14 = vld [vmem:[#allocation8 + $0x2] ss:$0 sm:$0xff]  ;;  %v248_v18 = vld [vmem:[#allocation7 + $0x190] sm:$0xff] }
  0x2d   :  { %189 = vmatpush.msra.mxu2 %v167_v33  ;;  %228 = vmatpush.msra.mxu3 %v214_v49  ;;  %v247_v19 = vld [vmem:[#allocation7 + $0x188] sm:$0xff]  ;;  %v246_v20 = vld [vmem:[#allocation7 + $0x180] sm:$0xff]  ;;  %v300_v25 = vld [vmem:[#allocation7 + $0x258] sm:$0xff] }
  0x2e   :  { %150 = vmatpush.msra.mxu1 %v120_v21  ;;  %270 = vmatpush.msrb.mxu0 %v258_v4  ;;  %v304_v21 = vld [vmem:[#allocation7 + $0x278] sm:$0xff]  ;;  %v299_v26 = vld [vmem:[#allocation7 + $0x250] sm:$0xff]  ;;  %v298_v27 = vld [vmem:[#allocation7 + $0x248] sm:$0xff] }
  0x2f   :  { %190 = vmatpush.msra.mxu2 %v166_v34  ;;  %229 = vmatpush.msra.mxu3 %v213_v50  ;;  %v297_v28 = vld [vmem:[#allocation7 + $0x240] sm:$0xff]  ;;  %v296_v29 = vld [vmem:[#allocation7 + $0x238] sm:$0xff]  ;;  %v295_v30 = vld [vmem:[#allocation7 + $0x230] sm:$0xff] }
  0x30   :  { %151 = vmatpush.msra.mxu1 %v119_v22  ;;  %271 = vmatpush.msrb.mxu0 %v257_v5  ;;  %v303_v22 = vld [vmem:[#allocation7 + $0x270] sm:$0xff]  ;;  %v294_v31 = vld [vmem:[#allocation7 + $0x228] sm:$0xff]  ;;  %v293_v32 = vld [vmem:[#allocation7 + $0x220] sm:$0xff] }
  0x31   :  { %191 = vmatpush.msra.mxu2 %v165_v35  ;;  %230 = vmatpush.msra.mxu3 %v212_v51  ;;  %v292_v33 = vld [vmem:[#allocation7 + $0x218] sm:$0xff]  ;;  %v449_v34 = vld [vmem:[#allocation8 + $0x3] ss:$0 sm:$0xff]  ;;  %v342_v46 = vld [vmem:[#allocation7 + $0x2d0] sm:$0xff] }
  0x32   :  { %152 = vmatpush.msra.mxu1 %v118_v23  ;;  %272 = vmatpush.msrb.mxu0 %v256_v6  ;;  %v302_v23 = vld [vmem:[#allocation7 + $0x268] sm:$0xff]  ;;  %v343_v45 = vld [vmem:[#allocation7 + $0x2d8] sm:$0xff]  ;;  %v340_v48 = vld [vmem:[#allocation7 + $0x2c0] sm:$0xff] }
  0x33   :  { %192 = vmatpush.msra.mxu2 %v164_v36  ;;  %231 = vmatpush.msra.mxu3 %v211_v52  ;;  %v341_v47 = vld [vmem:[#allocation7 + $0x2c8] sm:$0xff]  ;;  %v339_v49 = vld [vmem:[#allocation7 + $0x2b8] sm:$0xff]  ;;  %v338_v50 = vld [vmem:[#allocation7 + $0x2b0] sm:$0xff] }
  0x34   :  { %153 = vmatpush.msra.mxu1 %v117_v24  ;;  %273 = vmatpush.msrb.mxu0 %v255_v7  ;;  %v301_v24 = vld [vmem:[#allocation7 + $0x260] sm:$0xff]  ;;  %v337_v51 = vld [vmem:[#allocation7 + $0x2a8] sm:$0xff]  ;;  %v386_v1 = vld [vmem:[#allocation7 + $0x358] sm:$0xff] }
  0x35   :  { %193 = vmatpush.msra.mxu2 %v163_v37  ;;  %232 = vmatpush.msra.mxu3 %v210_v53  ;;  %v336_v52 = vld [vmem:[#allocation7 + $0x2a0] sm:$0xff]  ;;  %v335_v53 = vld [vmem:[#allocation7 + $0x298] sm:$0xff]  ;;  %v385_v2 = vld [vmem:[#allocation7 + $0x350] sm:$0xff] }
  0x36   :  { %274 = vmatpush.msrb.mxu0 %v254_v8  ;;  %310 = vmatpush.msrb.mxu1 %v304_v21  ;;  %v384_v3 = vld [vmem:[#allocation7 + $0x348] sm:$0xff]  ;;  %v383_v4 = vld [vmem:[#allocation7 + $0x340] sm:$0xff]  ;;  %v382_v5 = vld [vmem:[#allocation7 + $0x338] sm:$0xff] }
  0x37   :  { %194 = vmatpush.msra.mxu2 %v162_v42  ;;  %233 = vmatpush.msra.mxu3 %v209_v54  ;;  %v346_v42 = vld [vmem:[#allocation7 + $0x2f0] sm:$0xff]  ;;  %v450_v54 = vld [vmem:[#allocation8 + $0x4] ss:$0 sm:$0xff]  ;;  %v380_v7 = vld [vmem:[#allocation7 + $0x328] sm:$0xff] }
  0x38   :  { %275 = vmatpush.msrb.mxu0 %v253_v9  ;;  %311 = vmatpush.msrb.mxu1 %v303_v22  ;;  %v381_v6 = vld [vmem:[#allocation7 + $0x330] sm:$0xff]  ;;  %v379_v8 = vld [vmem:[#allocation7 + $0x320] sm:$0xff]  ;;  %v378_v9 = vld [vmem:[#allocation7 + $0x318] sm:$0xff] }
  0x39   :  { %195 = vmatpush.msra.mxu2 %v161_v43  ;;  %234 = vmatpush.msra.mxu3 %v208_v55  ;;  %v345_v43 = vld [vmem:[#allocation7 + $0x2e8] sm:$0xff]  ;;  %v453_v21 = vld [vmem:[#allocation8 + $0x7] ss:$0 sm:$0xff] }
  0x3a   :  { %276 = vmatpush.msrb.mxu0 %v252_v10  ;;  %312 = vmatpush.msrb.mxu1 %v302_v23  ;;  %v451_v10 = vld [vmem:[#allocation8 + $0x5] ss:$0 sm:$0xff] }
  0x3b   :  { %196 = vmatpush.msra.mxu2 %v160_v44  ;;  %235 = vmatpush.msra.mxu3 %v207_v56  ;;  %v344_v44 = vld [vmem:[#allocation7 + $0x2e0] sm:$0xff] }
  0x3c   :  { %277 = vmatpush.msrb.mxu0 %v251_v11  ;;  %313 = vmatpush.msrb.mxu1 %v301_v24 }
  0x3d   :  { %236 = vmatpush.msra.mxu3 %v206_v57 }
  0x3e   :  { %278 = vmatpush.msrb.mxu0 %v250_v12  ;;  %314 = vmatpush.msrb.mxu1 %v300_v25 }
  0x3f   :  { %237 = vmatpush.msra.mxu3 %v205_v62  ;;  %v389_v62 = vld [vmem:[#allocation7 + $0x370] sm:$0xff] }
  0x40   :  { %279 = vmatpush.msrb.mxu0 %v249_v13  ;;  %315 = vmatpush.msrb.mxu1 %v299_v26 }
  0x41   :  { %238 = vmatpush.msra.mxu3 %v204_v63  ;;  %v388_v63 = vld [vmem:[#allocation7 + $0x368] sm:$0xff] }
  0x42   :  { %280 = vmatpush.msrb.mxu0 %v248_v18  ;;  %316 = vmatpush.msrb.mxu1 %v298_v27 }
  0x43   :  { %239 = vmatpush.msra.mxu3 %v203_v0  ;;  %v387_v0 = vld [vmem:[#allocation7 + $0x360] sm:$0xff] }
  0x44   :  { %281 = vmatpush.msrb.mxu0 %v247_v19  ;;  %317 = vmatpush.msrb.mxu1 %v297_v28 }
  0x46   :  { %282 = vmatpush.msrb.mxu0 %v246_v20  ;;  %318 = vmatpush.msrb.mxu1 %v296_v29 }
  0x48   :  { %319 = vmatpush.msrb.mxu1 %v295_v30 }
  0x4a   :  { %320 = vmatpush.msrb.mxu1 %v294_v31 }
  0x4c   :  { %321 = vmatpush.msrb.mxu1 %v293_v32 }
  0x4e   :  { %322 = vmatpush.msrb.mxu1 %v292_v33 }
  0xa1   :  { %v113_v39 = vpop.f32.mrf.mxu0 }
  0xa2   :  { %v114_v40 = vadd.f32 %v446_v38, %v113_v39  ;;  %v291_v38 = vld [vmem:[#allocation7 + $0x210] sm:$0xff]  ;;  %v290_v39 = vld [vmem:[#allocation7 + $0x208] sm:$0xff] }
  0xa3   :  { %323 = vmatpush.msrb.mxu1 %v291_v38 }
  0xa4   :  { %v116_v41 = vmax.f32 %v114_v40, 0.0  ;;  %v289_v40 = vld [vmem:[#allocation7 + $0x200] sm:$0xff] }
  0xa5   :  { %324 = vmatpush.msrb.mxu1 %v290_v39 }
  0xa6   :  { %154 = vmatmul.f32.vlgmr.msra.gmra.mxu1 %v116_v41  ;;  %v347_v41 = vld [vmem:[#allocation7 + $0x2f8] sm:$0xff] }
  0xa7   :  { %325 = vmatpush.msrb.mxu1 %v289_v40  ;;  %353 = vmatpush.msrb.mxu2 %v347_v41 }
  0xa9   :  { %354 = vmatpush.msrb.mxu2 %v346_v42 }
  0xab   :  { %355 = vmatpush.msrb.mxu2 %v345_v43 }
  0xad   :  { %356 = vmatpush.msrb.mxu2 %v344_v44 }
  0xaf   :  { %357 = vmatpush.msrb.mxu2 %v343_v45 }
  0xb1   :  { %358 = vmatpush.msrb.mxu2 %v342_v46 }
  0xb3   :  { %359 = vmatpush.msrb.mxu2 %v341_v47 }
  0xb5   :  { %360 = vmatpush.msrb.mxu2 %v340_v48 }
  0xb7   :  { %361 = vmatpush.msrb.mxu2 %v339_v49 }
  0xb9   :  { %362 = vmatpush.msrb.mxu2 %v338_v50 }
  0xbb   :  { %363 = vmatpush.msrb.mxu2 %v337_v51 }
  0xbd   :  { %364 = vmatpush.msrb.mxu2 %v336_v52 }
  0xbf   :  { %365 = vmatpush.msrb.mxu2 %v335_v53 }
 0x123   :  { %v155_v59 = vpop.f32.mrf.mxu1 }
 0x124   :  { %v156_v60 = vadd.f32 %v447_v58, %v155_v59  ;;  %v334_v58 = vld [vmem:[#allocation7 + $0x290] sm:$0xff]  ;;  %v333_v59 = vld [vmem:[#allocation7 + $0x288] sm:$0xff] }
 0x125   :  { %366 = vmatpush.msrb.mxu2 %v334_v58 }
 0x126   :  { %v158_v61 = vmax.f32 %v156_v60, 0.0  ;;  %v332_v60 = vld [vmem:[#allocation7 + $0x280] sm:$0xff] }
 0x127   :  { %367 = vmatpush.msrb.mxu2 %v333_v59 }
 0x128   :  { %197 = vmatmul.f32.vlgmr.msra.gmra.mxu2 %v158_v61  ;;  %v390_v61 = vld [vmem:[#allocation7 + $0x378] sm:$0xff] }
 0x129   :  { %368 = vmatpush.msrb.mxu2 %v332_v60  ;;  %396 = vmatpush.msrb.mxu3 %v390_v61 }
 0x12b   :  { %397 = vmatpush.msrb.mxu3 %v389_v62 }
 0x12d   :  { %398 = vmatpush.msrb.mxu3 %v388_v63 }
 0x12f   :  { %399 = vmatpush.msrb.mxu3 %v387_v0 }
 0x131   :  { %400 = vmatpush.msrb.mxu3 %v386_v1 }
 0x133   :  { %401 = vmatpush.msrb.mxu3 %v385_v2 }
 0x135   :  { %402 = vmatpush.msrb.mxu3 %v384_v3 }
 0x137   :  { %403 = vmatpush.msrb.mxu3 %v383_v4 }
 0x139   :  { %404 = vmatpush.msrb.mxu3 %v382_v5 }
 0x13b   :  { %405 = vmatpush.msrb.mxu3 %v381_v6 }
 0x13d   :  { %406 = vmatpush.msrb.mxu3 %v380_v7 }
 0x13f   :  { %407 = vmatpush.msrb.mxu3 %v379_v8 }
 0x141   :  { %408 = vmatpush.msrb.mxu3 %v378_v9 }
 0x1ab   :  { %v198_v15 = vpop.f32.mrf.mxu2 }
 0x1ac   :  { %v199_v16 = vadd.f32 %v448_v14, %v198_v15  ;;  %v377_v14 = vld [vmem:[#allocation7 + $0x310] sm:$0xff]  ;;  %v376_v15 = vld [vmem:[#allocation7 + $0x308] sm:$0xff] }
 0x1ad   :  { %409 = vmatpush.msrb.mxu3 %v377_v14 }
 0x1ae   :  { %v201_v17 = vmax.f32 %v199_v16, 0.0  ;;  %v375_v16 = vld [vmem:[#allocation7 + $0x300] sm:$0xff] }
 0x1af   :  { %410 = vmatpush.msrb.mxu3 %v376_v15 }
 0x1b0   :  { %240 = vmatmul.f32.vlgmr.msra.gmra.mxu3 %v201_v17  ;;  %v452_v17 = vld [vmem:[#allocation8 + $0x6] ss:$0 sm:$0xff] }
 0x1b1   :  { %411 = vmatpush.msrb.mxu3 %v375_v16 }
 0x233   :  { %v241_v35 = vpop.f32.mrf.mxu3 }
 0x234   :  { %v242_v36 = vadd.f32 %v449_v34, %v241_v35 }
 0x236   :  { %v244_v37 = vmax.f32 %v242_v36, 0.0 }
 0x238   :  { %283 = vmatmul.f32.vlgmr.msrb.gmra.mxu0 %v244_v37 }
 0x2b5   :  { %v284_v55 = vpop.f32.mrf.mxu0 }
 0x2b6   :  { %v285_v56 = vadd.f32 %v450_v54, %v284_v55 }
 0x2b8   :  { %v287_v57 = vmax.f32 %v285_v56, 0.0 }
 0x2ba   :  { %326 = vmatmul.f32.vlgmr.msrb.gmra.mxu1 %v287_v57 }
 0x337   :  { %v327_v11 = vpop.f32.mrf.mxu1 }
 0x338   :  { %v328_v12 = vadd.f32 %v451_v10, %v327_v11 }
 0x33a   :  { %v330_v13 = vmax.f32 %v328_v12, 0.0 }
 0x33c   :  { %369 = vmatmul.f32.vlgmr.msrb.gmra.mxu2 %v330_v13 }
 0x3bf   :  { %v370_v18 = vpop.f32.mrf.mxu2 }
 0x3c0   :  { %v371_v19 = vadd.f32 %v452_v17, %v370_v18 }
 0x3c2   :  { %v373_v20 = vmax.f32 %v371_v19, 0.0 }
 0x3c4   :  { %412 = vmatmul.f32.vlgmr.msrb.gmra.mxu3 %v373_v20 }
 0x447   :  { %v413_v22 = vpop.f32.mrf.mxu3 }
 0x448   :  { %v414_v23 = vadd.f32 %v453_v21, %v413_v22 }
 0x44a   :  { %416 = vst [vmem:[#allocation10] sm:$0xff] %v414_v23 }
 0x44b   :  { %427 = dma.vmem_to_hbm [thread:$0]  %s423_s3, 128, %s425_s13, [#allocation4]  }
 0x44c   :  { %580 = dma.done.wait [#allocation4], 128  }
 0x44d   :  { %581 = vsyncadd [#allocation4], 4294967168 }
 0x44e   :  { %432 = vsyncpa [#allocation3], 1 }
 0x44f   :  { %433 = vsyncpa [#allocation6], 1 }
 0x450   :  { %434 = vsyncpa [#allocation9], 1 }
 0x451   :  { %435 = vsyncpa [#allocation4], 1 }

</bundles_post_ra>
